<compile_context>
chip_gen: v5e
topology: v5e:2x2
jax: 0.10.0
libtpu: 0.0.40
codegen_flags: <defaults>
</compile_context>

<pallas_src>
import jax
import jax.numpy as jnp
from jax.experimental import pallas as pl
from jax.experimental.pallas import tpu as pltpu


def _round_up(v, m):
    return ((v + m - 1) // m) * m


def _make_kernel(per_feature, f_pad, denom_col, mask_rows, n_valid_nodes):
    def kernel(seg_ref, x_ref, w_ref, b_ref, out_ref, acc_ref):
        g = pl.program_id(0)           # graph band (parallel)
        i = pl.program_id(1)           # node tile (reduction, "arbitrary")
        n_tiles = pl.num_programs(1)
        tn = x_ref.shape[0]
        bb = out_ref.shape[0]

        x = x_ref[...].astype(jnp.float32)                     # [TN, F_pad]
        if mask_rows:
            # Unpadded x: the last node tile reads past the array end; the OOB
            # rows hold unspecified data, so zero them before any use.
            row = i * tn + jax.lax.broadcasted_iota(jnp.int32, (tn, 1), 0)
            x = jnp.where(row < n_valid_nodes, x, 0.0)

        seg = seg_ref[...]                                     # [1, TN] int32
        w = w_ref[...]                                         # [F_pad, A_pad]
        b = b_ref[...]                                         # [1, A_pad]

        # a_j = exp(tanh(x @ W + b))  — MXU matmul + EUP transcendentals.
        a = jnp.exp(jnp.tanh(jnp.dot(x, w, preferred_element_type=jnp.float32) + b))

        # One-hot segment matrix for this band: S[r, n] = (seg[n] == g*BB + r).
        # Pure VPU iota/compare; padded nodes carry an out-of-range id.
        graph_ids = g * bb + jax.lax.broadcasted_iota(jnp.int32, (bb, tn), 0)
        onehot = (graph_ids == seg).astype(jnp.float32)        # [BB, TN]

        @pl.when(i == 0)
        def _():
            acc_ref[...] = jnp.zeros_like(acc_ref)

        if per_feature:
            # acc layout: [:, :F_pad] numerator, [:, F_pad:] per-feature denominator.
            acc_ref[:, :f_pad] += jnp.dot(onehot, a * x,
                                          preferred_element_type=jnp.float32)
            acc_ref[:, f_pad:] += jnp.dot(onehot, a,
                                          preferred_element_type=jnp.float32)
        else:
            a0 = a[:, 0:1]                                     # scalar attention
            if denom_col is not None:
                # Spare zero-padded feature column: stash a_j there so a single
                # matmul produces both the weighted sum and the normaliser.
                lane = jax.lax.broadcasted_iota(jnp.int32, (tn, f_pad), 1)
                rhs = jnp.where(lane == denom_col, a0, a0 * x)
                acc_ref[...] += jnp.dot(onehot, rhs,
                                        preferred_element_type=jnp.float32)
            else:
                acc_ref[:, :f_pad] += jnp.dot(onehot, a0 * x,
                                              preferred_element_type=jnp.float32)
                acc_ref[:, f_pad:] += jnp.dot(onehot, a,
                                              preferred_element_type=jnp.float32)

        @pl.when(i == n_tiles - 1)
        def _():
            acc = acc_ref[...]
            num = acc[:, :f_pad]
            if per_feature:
                den = acc[:, f_pad:]
            elif denom_col is not None:
                den = acc[:, denom_col:denom_col + 1]
            else:
                den = acc[:, f_pad:f_pad + 1]
            # Guard the denominator BEFORE the reciprocal: empty/padded graphs
            # yield exactly 0 (matches scatter_add) with no transient 0/0 NaNs.
            inv = pl.reciprocal(jnp.where(den > 0.0, den, 1.0))
            out_ref[...] = (num * inv).astype(out_ref.dtype)

    return kernel


def attention_global_pool(x, batch_segmentation, weight, bias, num_graphs, *,
                          attention_per_feature=None, node_tile=None,
                          graph_band=256):
    """Pallas forward of AttentionGlobalPool.

    x: [N, F] float, batch_segmentation: [N] int, weight: [F, n_out],
    bias: [n_out].  Returns pooled features [num_graphs, F] in x.dtype.
    """
    n_nodes, n_features = x.shape
    n_out = weight.shape[1]
    if attention_per_feature is None:
        attention_per_feature = n_out != 1

    out_dtype = x.dtype
    f_pad = _round_up(n_features, 128)
    a_pad = f_pad if attention_per_feature else 128

    # Scalar attention + padded feature dim: spare-column denominator trick.
    denom_col = None
    if not attention_per_feature and n_features < f_pad:
        denom_col = n_features

    if attention_per_feature:
        acc_width = 2 * f_pad
    elif denom_col is not None:
        acc_width = f_pad
    else:
        acc_width = f_pad + a_pad

    # Graph bands: parallel axis for the second TensorCore, bounded acc/out blocks.
    b_pad = _round_up(max(num_graphs, 1), 8)
    if b_pad <= graph_band:
        bb = b_pad
    else:
        bb = _round_up(graph_band, 8)
        b_pad = _round_up(b_pad, bb)
    n_bands = b_pad // bb

    # Resident weight: single-buffer it once it is big enough to matter.
    w_bytes = f_pad * a_pad * 4
    single_buffer_w = w_bytes >= 512 * 1024
    w_bufs = 1 if single_buffer_w else 2

    # Node tile: ~2 MiB per x block, multiple of 128, shrunk to fit the VMEM budget.
    target_block_bytes = 2 * 1024 * 1024
    tn = (target_block_bytes // (4 * f_pad)) if node_tile is None else node_tile
    tn = _round_up(max(tn, 128), 128)
    tn = min(tn, 4096)
    tn = min(tn, _round_up(n_nodes, 128))

    x_itemsize = jnp.dtype(x.dtype).itemsize if n_features == f_pad else 4
    out_itemsize = jnp.dtype(out_dtype).itemsize

    def vmem_estimate(tn_):
        return (2 * tn_ * f_pad * x_itemsize            # x blocks (double-buffered)
                + 2 * tn_ * 4                           # seg blocks
                + w_bufs * (f_pad * a_pad + a_pad) * 4  # resident weight + bias
                + bb * acc_width * 4                    # accumulator scratch
                + 2 * bb * f_pad * out_itemsize)        # output block

    vmem_budget = 40 * 1024 * 1024                      # headroom under v7x's 64 MiB
    while vmem_estimate(tn) > vmem_budget and tn > 128:
        tn = max(128, tn - 128)
    vmem_limit = int(min(max(2 * vmem_estimate(tn), 32 * 1024 * 1024),
                         64 * 1024 * 1024))

    n_tiles = -(-n_nodes // tn)
    n_pad = n_tiles * tn

    # x: skip the full HBM re-pad copy when F is already lane-aligned; mask the
    # ragged tail rows in-kernel instead.
    if n_features == f_pad:
        x_in = x
        mask_rows = (n_nodes % tn) != 0
    else:
        x_in = jnp.zeros((n_pad, f_pad), jnp.float32)
        x_in = x_in.at[:n_nodes, :n_features].set(x.astype(jnp.float32))
        mask_rows = False

    # Padded nodes get an out-of-range graph id -> they match no one-hot row.
    seg_p = jnp.full((1, n_pad), b_pad, jnp.int32)
    seg_p = seg_p.at[0, :n_nodes].set(batch_segmentation.astype(jnp.int32))

    w_p = jnp.zeros((f_pad, a_pad), jnp.float32)
    w_p = w_p.at[:n_features, :n_out].set(weight.astype(jnp.float32))
    b_p = jnp.zeros((1, a_pad), jnp.float32)
    b_p = b_p.at[0, :n_out].set(bias.astype(jnp.float32))

    if single_buffer_w:
        w_spec = pl.BlockSpec((f_pad, a_pad), lambda g, i: (0, 0),
                              pipeline_mode=pl.Buffered(1))
        b_spec = pl.BlockSpec((1, a_pad), lambda g, i: (0, 0),
                              pipeline_mode=pl.Buffered(1))
    else:
        w_spec = pl.BlockSpec((f_pad, a_pad), lambda g, i: (0, 0))
        b_spec = pl.BlockSpec((1, a_pad), lambda g, i: (0, 0))

    out = pl.pallas_call(
        _make_kernel(attention_per_feature, f_pad, denom_col, mask_rows, n_nodes),
        out_shape=jax.ShapeDtypeStruct((b_pad, f_pad), out_dtype),
        grid_spec=pltpu.PrefetchScalarGridSpec(
            num_scalar_prefetch=0,
            grid=(n_bands, n_tiles),
            in_specs=[
                pl.BlockSpec((1, tn), lambda g, i: (0, i)),       # seg tile
                pl.BlockSpec((tn, f_pad), lambda g, i: (i, 0)),   # x tile (pipelined)
                w_spec,                                           # weight (resident)
                b_spec,                                           # bias (resident)
            ],
            out_specs=pl.BlockSpec((bb, f_pad), lambda g, i: (g, 0)),
            scratch_shapes=[pltpu.VMEM((bb, acc_width), jnp.float32)],
        ),
        compiler_params=pltpu.CompilerParams(
            dimension_semantics=("parallel", "arbitrary"),
            vmem_limit_bytes=vmem_limit,
        ),
    )(seg_p, x_in, w_p, b_p)

    return out[:num_graphs, :n_features].astype(x.dtype)


def init_params(key, n_features, attention_per_feature=False):
    """Deterministic parameter init matching torch: xavier_uniform_(w, tanh gain)."""
    n_out = n_features if attention_per_feature else 1
    gain = 5.0 / 3.0  # torch.nn.init.calculate_gain('tanh')
    bound = gain * jnp.sqrt(6.0 / (n_features + n_out))
    w = jax.random.uniform(key, (n_features, n_out), jnp.float32, -bound, bound)
    b = jnp.zeros((n_out,), jnp.float32)
    return w, b


def reference_pool(x, seg, weight, bias, num_graphs):
    """Pure-JAX reference of the PyTorch forward pass."""
    e = jnp.tanh(jnp.dot(x, weight, precision=jax.lax.Precision.HIGHEST) + bias)
    a = jnp.exp(e)
    a_norm = jax.ops.segment_sum(a, seg, num_segments=num_graphs)
    a = a / a_norm[seg]
    return jax.ops.segment_sum(a * x, seg, num_segments=num_graphs)


if __name__ == "__main__":
    key = jax.random.PRNGKey(0)
    keys = jax.random.split(key, 6)

    # Case A: F=32 (padded feature dim -> spare-column denominator in the scalar
    # path), 4 sorted graphs of 4 nodes each.
    n_nodes_a, n_features_a, num_graphs_a = 16, 32, 4
    x_a = jax.random.normal(keys[0], (n_nodes_a, n_features_a), jnp.float32)
    seg_a = jnp.repeat(jnp.arange(num_graphs_a, dtype=jnp.int32),
                       n_nodes_a // num_graphs_a)

    # Case B: F=128 (lane-aligned -> x passed unpadded, ragged node tile masked
    # in-kernel), 3 interleaved graphs over 48 nodes.
    n_nodes_b, n_features_b, num_graphs_b = 48, 128, 3
    x_b = jax.random.normal(keys[1], (n_nodes_b, n_features_b), jnp.float32)
    seg_b = jnp.arange(n_nodes_b, dtype=jnp.int32) % num_graphs_b

    cases = [
        (x_a, seg_a, num_graphs_a, False, keys[2]),
        (x_a, seg_a, num_graphs_a, True, keys[3]),
        (x_b, seg_b, num_graphs_b, False, keys[4]),
        (x_b, seg_b, num_graphs_b, True, keys[5]),
    ]

    ok = True
    for xv, segv, ng, per_feature, kw in cases:
        w, b = init_params(kw, xv.shape[1], attention_per_feature=per_feature)
        out = attention_global_pool(xv, segv, w, b, ng,
                                    attention_per_feature=per_feature)
        out = jax.block_until_ready(out)
        ref = reference_pool(xv, segv, w, b, ng)
        ok = ok and bool(jnp.allclose(out, ref, rtol=1e-4, atol=1e-4))

    print("KERNEL_OK" if ok else "KERNEL_MISMATCH")
</pallas_src>

<mosaic_0001>
module attributes {stable_mosaic.version = 11 : i64} {
  func.func @kernel(%arg0: i32, %arg1: i32, %arg2: memref<1x128xi32, #tpu.memory_space<vmem>>, %arg3: memref<128x128xf32, #tpu.memory_space<vmem>>, %arg4: memref<128x128xf32, #tpu.memory_space<vmem>>, %arg5: memref<1x128xf32, #tpu.memory_space<vmem>>, %arg6: memref<8x128xf32, #tpu.memory_space<vmem>>, %arg7: memref<8x128xf32, #tpu.memory_space<vmem>>) attributes {dimension_semantics = [#tpu.dimension_semantics<parallel>, #tpu.dimension_semantics<arbitrary>], iteration_bounds = array<i64: 1, 1>, scalar_prefetch = 0 : i64, scratch_operands = 1 : i64, tpu.core_type = #tpu.core_type<tc>, window_params = [{transform_indices = @transform_0, window_bounds = array<i64: 1, 128>}, {transform_indices = @transform_1, window_bounds = array<i64: 128, 128>}, {pipeline_mode = #tpu.pipeline_mode<synchronous>, transform_indices = @transform_2, window_bounds = array<i64: 128, 128>}, {pipeline_mode = #tpu.pipeline_mode<synchronous>, transform_indices = @transform_3, window_bounds = array<i64: 1, 128>}, {transform_indices = @transform_4, window_bounds = array<i64: 8, 128>}]} {
    %c0 = arith.constant 0 : index
    %c0_0 = arith.constant 0 : index
    %0 = vector.load %arg3[%c0, %c0_0] : memref<128x128xf32, #tpu.memory_space<vmem>>, vector<128x128xf32>
    %c0_1 = arith.constant 0 : index
    %c0_2 = arith.constant 0 : index
    %1 = vector.load %arg2[%c0_1, %c0_2] : memref<1x128xi32, #tpu.memory_space<vmem>>, vector<1x128xi32>
    %c0_3 = arith.constant 0 : index
    %c0_4 = arith.constant 0 : index
    %2 = vector.load %arg4[%c0_3, %c0_4] : memref<128x128xf32, #tpu.memory_space<vmem>>, vector<128x128xf32>
    %c0_5 = arith.constant 0 : index
    %c0_6 = arith.constant 0 : index
    %3 = vector.load %arg5[%c0_5, %c0_6] : memref<1x128xf32, #tpu.memory_space<vmem>>, vector<1x128xf32>
    %cst = arith.constant dense<0.000000e+00> : vector<128x128xf32>
    %4 = tpu.matmul %0, %2, %cst {dimension_numbers = #tpu.dot_dimension_numbers<[1], [0], [0], [1], [0, 0, 1, 1], [], []>} : vector<128x128xf32>, vector<128x128xf32>, vector<128x128xf32> -> vector<128x128xf32>
    %5 = vector.broadcast %3 : vector<1x128xf32> to vector<128x128xf32>
    %6 = arith.addf %4, %5 : vector<128x128xf32>
    %7 = math.tanh %6 : vector<128x128xf32>
    %8 = math.exp %7 : vector<128x128xf32>
    %c8_i32 = arith.constant 8 : i32
    %9 = arith.muli %arg0, %c8_i32 : i32
    %10 = tpu.iota {dimensions = array<i32: 0>} : vector<8x128xi32>
    %11 = vector.broadcast %9 : i32 to vector<8x128xi32>
    %12 = arith.addi %11, %10 : vector<8x128xi32>
    %13 = vector.broadcast %1 : vector<1x128xi32> to vector<8x128xi32>
    %14 = arith.cmpi eq, %12, %13 : vector<8x128xi32>
    %15 = arith.extui %14 : vector<8x128xi1> to vector<8x128xi32>
    %16 = arith.sitofp %15 : vector<8x128xi32> to vector<8x128xf32>
    %c0_i32 = arith.constant 0 : i32
    %17 = arith.cmpi eq, %arg1, %c0_i32 : i32
    %18 = arith.extui %17 : i1 to i32
    %c0_i32_7 = arith.constant 0 : i32
    %19 = arith.cmpi ne, %18, %c0_i32_7 : i32
    scf.if %19 {
      %cst_15 = arith.constant 0.000000e+00 : f32
      %36 = vector.broadcast %cst_15 : f32 to vector<8x128xf32>
      %c0_16 = arith.constant 0 : index
      %c0_17 = arith.constant 0 : index
      %37 = vector.load %arg7[%c0_16, %c0_17] : memref<8x128xf32, #tpu.memory_space<vmem>>, vector<8x128xf32>
      tpu.vector_store %arg7[%c0_16, %c0_17], %36 {strides = array<i32>} : memref<8x128xf32, #tpu.memory_space<vmem>>, vector<8x128xf32>,
    } else {
    }
    %20 = vector.extract_strided_slice %8 {offsets = [0, 0], sizes = [128, 1], strides = [1, 1]} : vector<128x128xf32> to vector<128x1xf32>
    %21 = tpu.iota {dimensions = array<i32: 1>} : vector<128x128xi32>
    %c32_i32 = arith.constant 32 : i32
    %22 = vector.broadcast %c32_i32 : i32 to vector<128x128xi32>
    %23 = arith.cmpi eq, %21, %22 : vector<128x128xi32>
    %24 = vector.broadcast %20 : vector<128x1xf32> to vector<128x128xf32>
    %25 = arith.mulf %24, %0 : vector<128x128xf32>
    %26 = vector.shape_cast %20 : vector<128x1xf32> to vector<128x1xf32>
    %27 = vector.broadcast %26 : vector<128x1xf32> to vector<128x128xf32>
    %28 = arith.select %23, %27, %25 : vector<128x128xi1>, vector<128x128xf32>
    %c0_8 = arith.constant 0 : index
    %c0_9 = arith.constant 0 : index
    %29 = vector.load %arg7[%c0_8, %c0_9] : memref<8x128xf32, #tpu.memory_space<vmem>>, vector<8x128xf32>
    %cst_10 = arith.constant dense<0.000000e+00> : vector<8x128xf32>
    %30 = tpu.matmul %16, %28, %cst_10 {dimension_numbers = #tpu.dot_dimension_numbers<[1], [0], [0], [1], [0, 0, 1, 1], [], []>} : vector<8x128xf32>, vector<128x128xf32>, vector<8x128xf32> -> vector<8x128xf32>
    %31 = arith.addf %29, %30 : vector<8x128xf32>
    %c0_11 = arith.constant 0 : index
    %c0_12 = arith.constant 0 : index
    %32 = vector.load %arg7[%c0_11, %c0_12] : memref<8x128xf32, #tpu.memory_space<vmem>>, vector<8x128xf32>
    tpu.vector_store %arg7[%c0_11, %c0_12], %31 {strides = array<i32>} : memref<8x128xf32, #tpu.memory_space<vmem>>, vector<8x128xf32>,
    %c0_i32_13 = arith.constant 0 : i32
    %33 = arith.cmpi eq, %arg1, %c0_i32_13 : i32
    %34 = arith.extui %33 : i1 to i32
    %c0_i32_14 = arith.constant 0 : i32
    %35 = arith.cmpi ne, %34, %c0_i32_14 : i32
    scf.if %35 {
      %c0_15 = arith.constant 0 : index
      %c0_16 = arith.constant 0 : index
      %36 = vector.load %arg7[%c0_15, %c0_16] : memref<8x128xf32, #tpu.memory_space<vmem>>, vector<8x128xf32>
      %37 = vector.extract_strided_slice %36 {offsets = [0, 32], sizes = [8, 1], strides = [1, 1]} : vector<8x128xf32> to vector<8x1xf32>
      %cst_17 = arith.constant 0.000000e+00 : f32
      %38 = vector.broadcast %cst_17 : f32 to vector<8x1xf32>
      %39 = arith.cmpf ogt, %37, %38 : vector<8x1xf32>
      %cst_18 = arith.constant 1.000000e+00 : f32
      %40 = vector.broadcast %cst_18 : f32 to vector<8x1xf32>
      %41 = arith.select %39, %37, %40 : vector<8x1xi1>, vector<8x1xf32>
      %42 = tpu.reciprocal %41 : vector<8x1xf32> -> vector<8x1xf32>
      %43 = vector.broadcast %42 : vector<8x1xf32> to vector<8x128xf32>
      %44 = arith.mulf %36, %43 : vector<8x128xf32>
      %c0_19 = arith.constant 0 : index
      %c0_20 = arith.constant 0 : index
      %45 = vector.load %arg6[%c0_19, %c0_20] : memref<8x128xf32, #tpu.memory_space<vmem>>, vector<8x128xf32>
      tpu.vector_store %arg6[%c0_19, %c0_20], %44 {strides = array<i32>} : memref<8x128xf32, #tpu.memory_space<vmem>>, vector<8x128xf32>,
    } else {
    }
    return
  }
  func.func @transform_0(%arg0: i32, %arg1: i32) -> (i32, i32) {
    %c0_i32 = arith.constant 0 : i32
    %c0_i32_0 = arith.constant 0 : i32
    return %c0_i32, %arg1 : i32, i32
  }
  func.func @transform_1(%arg0: i32, %arg1: i32) -> (i32, i32) {
    %c0_i32 = arith.constant 0 : i32
    %c0_i32_0 = arith.constant 0 : i32
    return %arg1, %c0_i32 : i32, i32
  }
  func.func @transform_2(%arg0: i32, %arg1: i32) -> (i32, i32) {
    %c0_i32 = arith.constant 0 : i32
    %c0_i32_0 = arith.constant 0 : i32
    %c0_i32_1 = arith.constant 0 : i32
    return %c0_i32, %c0_i32_0 : i32, i32
  }
  func.func @transform_3(%arg0: i32, %arg1: i32) -> (i32, i32) {
    %c0_i32 = arith.constant 0 : i32
    %c0_i32_0 = arith.constant 0 : i32
    %c0_i32_1 = arith.constant 0 : i32
    return %c0_i32, %c0_i32_0 : i32, i32
  }
  func.func @transform_4(%arg0: i32, %arg1: i32) -> (i32, i32) {
    %c0_i32 = arith.constant 0 : i32
    %c0_i32_0 = arith.constant 0 : i32
    return %arg0, %c0_i32 : i32, i32
  }
}

</mosaic_0001>

<bundles_post_ra>
// kernel: tpu_custom_call.1
= control target key start
LH: loop header
LB: loop body
LE: loop exit
PB: predicated region body
PF: predicated region fallthrough
CT: control target
= control target key end

     0   :  { %9 = vsyncpa [#allocation4], 0  ;;  %s803_s0 = inlined_call_operand.hbm [shape: s32[1,128], index: 0, kind: input, shape index: {}]   ;;  %s804_s1 = inlined_call_operand.hbm [shape: f32[128,128], index: 1, kind: input, shape index: {}]   ;;  %s805_s2 = inlined_call_operand.hbm [shape: f32[128,128], index: 2, kind: input, shape index: {}]   ;;  %s806_s3 = inlined_call_operand.vmem [shape: f32[1,128], index: 3, kind: input, shape index: {}]   ;;  %s807_s4 = inlined_call_operand.hbm [shape: f32[8,128], index: 4, kind: output, shape index: {}]  }
   0x1   :  { %10 = vsyncpa [#allocation7], 0  ;;  %s27_s17 = sshll.u32 %s804_s1, 4  ;;  %s28_s17 = int_to_ptr.hbm [resolvable:$true] %s27_s17 }
   0x2   :  { %11 = vsyncpa [#allocation5], 0  ;;  %s628_s18 = smov [#allocation6]   ;;  %s17_s22 = sshll.u32 %s803_s0, 4  ;;  %s18_s22 = int_to_ptr.hbm [resolvable:$true] %s17_s22 }
   0x3   :  { %s29_s19 = sshll.u32 %s628_s18, 4  ;;  %s629_s23 = smov 128   ;;  %s30_s19 = int_to_ptr.vmem [resolvable:$true] %s29_s19 }
   0x4   :  { %s630_s24 = smov 8   ;;  %s631_s25 = smov [#allocation3]  }
   0x5   :  { %35 = dma.hbm_to_vmem [thread:$0]  %s28_s17, 2048, %s30_s19, [#allocation7], %s629_s23, %s629_s23, %s630_s24  }
   0x6   :  { %s19_s26 = sshll.u32 %s631_s25, 4  ;;  %s40_s29 = sshll.u32 %s805_s2, 4  ;;  %s20_s26 = int_to_ptr.vmem [resolvable:$true] %s19_s26  ;;  %s41_s29 = int_to_ptr.hbm [resolvable:$true] %s40_s29 }
   0x7   :  { %22 = dma.hbm_to_vmem [thread:$0]  %s18_s22, 16, %s20_s26, [#allocation4]  }
   0x8   :  { %s632_s1 = smov [#allocation8]  }
   0x9   :  { %s42_s30 = sshll.u32 %s632_s1, 4  ;;  %s43_s30 = int_to_ptr.vmem [resolvable:$true] %s42_s30 }
   0xa   :  { %48 = dma.hbm_to_vmem [thread:$0]  %s41_s29, 2048, %s43_s30, [#allocation7], %s629_s23, %s629_s23, %s630_s24  }
   0xb   :  { %622 = dma.done.wait [#allocation4], 16  }
   0xc   :  { %623 = vsyncadd [#allocation4], 4294967280 }
   0xd   :  { %624 = dma.done.wait [#allocation7], 4096  }
   0xe   :  { %625 = vsyncadd [#allocation7], 4294963200  ;;  %v95_v0 = vld [vmem:[#allocation8 + $0x78] sm:$0xff]  ;;  %v94_v1 = vld [vmem:[#allocation8 + $0x70] sm:$0xff]  ;;  %v633_v32 = vmov 0   ;;  %s399_s8 = sshll.u32 %s807_s4, 4  ;;  %s400_s8 = int_to_ptr.hbm [resolvable:$true] %s399_s8 }
   0xf   :  { %412 = vmatpush.msra.mxu2 %v95_v0  ;;  %413 = vmatpush.msra.mxu3 %v95_v0  ;;  %v93_v2 = vld [vmem:[#allocation8 + $0x68] sm:$0xff]  ;;  %v92_v3 = vld [vmem:[#allocation8 + $0x60] sm:$0xff]  ;;  %v91_v4 = vld [vmem:[#allocation8 + $0x58] sm:$0xff] }
  0x10   :  { %100 = vmatpush.msra.mxu0 %v95_v0  ;;  %v90_v5 = vld [vmem:[#allocation8 + $0x50] sm:$0xff]  ;;  %v89_v6 = vld [vmem:[#allocation8 + $0x48] sm:$0xff]  ;;  %v88_v7 = vld [vmem:[#allocation8 + $0x40] sm:$0xff]  ;;  %453 = vset.pattern.permute.xlu2 %v633_v32 }
  0x11   :  { %414 = vmatpush.msra.mxu2 %v94_v1  ;;  %415 = vmatpush.msra.mxu3 %v94_v1  ;;  %v87_v8 = vld [vmem:[#allocation8 + $0x38] sm:$0xff]  ;;  %v86_v9 = vld [vmem:[#allocation8 + $0x30] sm:$0xff]  ;;  %v85_v10 = vld [vmem:[#allocation8 + $0x28] sm:$0xff] }
  0x12   :  { %101 = vmatpush.msra.mxu0 %v94_v1  ;;  %v84_v11 = vld [vmem:[#allocation8 + $0x20] sm:$0xff]  ;;  %v83_v12 = vld [vmem:[#allocation8 + $0x18] sm:$0xff]  ;;  %v82_v13 = vld [vmem:[#allocation8 + $0x10] sm:$0xff]  ;;  %454 = vset.pattern.permute.xlu1 %v633_v32 }
  0x13   :  { %416 = vmatpush.msra.mxu2 %v93_v2  ;;  %417 = vmatpush.msra.mxu3 %v93_v2  ;;  %v81_v14 = vld [vmem:[#allocation8 + $0x8] sm:$0xff]  ;;  %v80_v15 = vld [vmem:[#allocation8] sm:$0xff]  ;;  %v679_v19 = vld [vmem:[#allocation6 + $0x50] sm:$0xff] }
  0x14   :  { %102 = vmatpush.msra.mxu0 %v93_v2  ;;  %v671_v16 = vld [vmem:[#allocation6 + $0x20] sm:$0xff]  ;;  %v673_v17 = vld [vmem:[#allocation6 + $0x48] sm:$0xff]  ;;  %v686_v21 = vld [vmem:[#allocation6 + $0x30] sm:$0xff]  ;;  %455 = vset.pattern.permute.xlu0 %v633_v32 }
  0x15   :  { %418 = vmatpush.msra.mxu2 %v92_v3  ;;  %419 = vmatpush.msra.mxu3 %v92_v3  ;;  %v677_v18 = vld [vmem:[#allocation6 + $0x28] sm:$0xff]  ;;  %v683_v20 = vld [vmem:[#allocation6] sm:$0xff]  ;;  %v688_v22 = vld [vmem:[#allocation6 + $0x58] sm:$0xff] }
  0x16   :  { %103 = vmatpush.msra.mxu0 %v92_v3  ;;  %v692_v23 = vld [vmem:[#allocation6 + $0x8] sm:$0xff]  ;;  %v695_v24 = vld [vmem:[#allocation6 + $0x38] sm:$0xff]  ;;  %v697_v25 = vld [vmem:[#allocation6 + $0x60] sm:$0xff] }
  0x17   :  { %420 = vmatpush.msra.mxu2 %v91_v4  ;;  %421 = vmatpush.msra.mxu3 %v91_v4  ;;  %v699_v26 = vld [vmem:[#allocation6 + $0x10] sm:$0xff]  ;;  %v704_v27 = vld [vmem:[#allocation6 + $0x68] sm:$0xff]  ;;  %v706_v28 = vld [vmem:[#allocation6 + $0x40] sm:$0xff] }
  0x18   :  { %104 = vmatpush.msra.mxu0 %v91_v4  ;;  %v708_v29 = vld [vmem:[#allocation6 + $0x18] sm:$0xff]  ;;  %v713_v30 = vld [vmem:[#allocation6 + $0x70] sm:$0xff] }
  0x19   :  { %422 = vmatpush.msra.mxu2 %v90_v5  ;;  %423 = vmatpush.msra.mxu3 %v90_v5  ;;  %v716_v31 = vld [vmem:[#allocation6 + $0x78] sm:$0xff] }
  0x1a   :  { %105 = vmatpush.msra.mxu0 %v90_v5  ;;  %v724_v35 = vld [vmem:[%s806_s3] ss:$0 sm:$0xff]  ;;  %s636_s3 = smov [#allocation9]  }
  0x1b   :  { %424 = vmatpush.msra.mxu2 %v89_v6  ;;  %425 = vmatpush.msra.mxu3 %v89_v6  ;;  %s397_s5 = sshll.u32 %s636_s3, 4  ;;  %s398_s5 = int_to_ptr.vmem [resolvable:$true] %s397_s5 }
  0x1c   :  { %106 = vmatpush.msra.mxu0 %v89_v6 }
  0x1d   :  { %426 = vmatpush.msra.mxu2 %v88_v7  ;;  %427 = vmatpush.msra.mxu3 %v88_v7 }
  0x1e   :  { %107 = vmatpush.msra.mxu0 %v88_v7 }
  0x1f   :  { %428 = vmatpush.msra.mxu2 %v87_v8  ;;  %429 = vmatpush.msra.mxu3 %v87_v8 }
  0x20   :  { %108 = vmatpush.msra.mxu0 %v87_v8 }
  0x21   :  { %430 = vmatpush.msra.mxu2 %v86_v9  ;;  %431 = vmatpush.msra.mxu3 %v86_v9 }
  0x22   :  { %109 = vmatpush.msra.mxu0 %v86_v9 }
  0x23   :  { %432 = vmatpush.msra.mxu2 %v85_v10  ;;  %433 = vmatpush.msra.mxu3 %v85_v10 }
  0x24   :  { %110 = vmatpush.msra.mxu0 %v85_v10 }
  0x25   :  { %434 = vmatpush.msra.mxu2 %v84_v11  ;;  %435 = vmatpush.msra.mxu3 %v84_v11 }
  0x26   :  { %111 = vmatpush.msra.mxu0 %v84_v11 }
  0x27   :  { %436 = vmatpush.msra.mxu2 %v83_v12  ;;  %437 = vmatpush.msra.mxu3 %v83_v12 }
  0x28   :  { %112 = vmatpush.msra.mxu0 %v83_v12 }
  0x29   :  { %438 = vmatpush.msra.mxu2 %v82_v13  ;;  %439 = vmatpush.msra.mxu3 %v82_v13 }
  0x2a   :  { %113 = vmatpush.msra.mxu0 %v82_v13 }
  0x2b   :  { %440 = vmatpush.msra.mxu2 %v81_v14  ;;  %441 = vmatpush.msra.mxu3 %v81_v14 }
  0x2c   :  { %114 = vmatpush.msra.mxu0 %v81_v14 }
  0x2d   :  { %442 = vmatpush.msra.mxu2 %v80_v15  ;;  %443 = vmatpush.msra.mxu3 %v80_v15 }
  0x2e   :  { %128 = vmatmul.f32.vlgmr.msra.gmra.mxu2 %v671_v16  ;;  %143 = vmatmul.f32.vlgmr.msra.gmra.mxu3 %v673_v17 }
  0x2f   :  { %115 = vmatpush.msra.mxu0 %v80_v15 }
  0x30   :  { %116 = vmatmul.f32.vlgmr.msra.gmra.mxu0 %v683_v20 }
  0x36   :  { %131 = vmatmul.f32.gmra.mxu2 %v677_v18  ;;  %146 = vmatmul.f32.gmra.mxu3 %v679_v19 }
  0x38   :  { %119 = vmatmul.f32.gmra.mxu0 %v692_v23 }
  0x3e   :  { %134 = vmatmul.f32.gmra.mxu2 %v686_v21  ;;  %149 = vmatmul.f32.gmra.mxu3 %v688_v22 }
  0x40   :  { %122 = vmatmul.f32.gmra.mxu0 %v699_v26 }
  0x46   :  { %137 = vmatmul.f32.gmra.mxu2 %v695_v24  ;;  %152 = vmatmul.f32.gmra.mxu3 %v697_v25 }
  0x48   :  { %125 = vmatmul.f32.gmra.mxu0 %v708_v29 }
  0x4e   :  { %155 = vmatmul.f32.gmra.mxu3 %v704_v27  ;;  %140 = vmatmul.f32.gmra.mxu2 %v706_v28 }
  0x56   :  { %158 = vmatmul.f32.gmra.mxu3 %v713_v30 }
  0x5e   :  { %161 = vmatmul.f32.gmra.mxu3 %v716_v31 }
  0xad   :  { %v732_v48 = vpop.f32.mrf.mxu0 }
  0xb1   :  { %v129_v33 = vpop.f32.mrf.mxu2  ;;  %v719_v34 = vpop.f32.mrf.mxu3 }
  0xb2   :  { %v130_v52 = vadd.f32 %v724_v35, %v129_v33 }
  0xb5   :  { %v120_v60 = vpop.f32.mrf.mxu0 }
  0xb6   :  { %v121_v63 = vadd.f32 %v724_v35, %v120_v60 }
  0xb9   :  { %v132_v36 = vpop.f32.mrf.mxu2  ;;  %v147_v37 = vpop.f32.mrf.mxu3 }
  0xba   :  { %v148_v38 = vadd.f32 %v724_v35, %v147_v37  ;;  %v133_v9 = vadd.f32 %v724_v35, %v132_v36  ;;  %v145_v37 = vadd.f32 %v724_v35, %v719_v34 }
  0xbc   :  { %460 = vtanh.f32 %v148_v38 }
  0xbd   :  { %v123_v13 = vpop.f32.mrf.mxu0 }
  0xbe   :  { %v124_v36 = vadd.f32 %v724_v35, %v123_v13 }
  0xc1   :  { %v727_v39 = vpop.f32.mrf.mxu2  ;;  %v150_v40 = vpop.f32.mrf.mxu3 }
  0xc2   :  { %v151_v41 = vadd.f32 %v724_v35, %v150_v40  ;;  %v461_v42 = vpop.eup %460  ;;  %v136_v34 = vadd.f32 %v724_v35, %v727_v39 }
  0xc3   :  { %v201_v43 = vmul.f32 1.442695, %v461_v42 }
  0xc4   :  { %462 = vtanh.f32 %v151_v41 }
  0xc5   :  { %464 = vpow2.f32 %v201_v43 }
  0xc9   :  { %v138_v44 = vpop.f32.mrf.mxu2  ;;  %v153_v45 = vpop.f32.mrf.mxu3 }
  0xca   :  { %v139_v46 = vadd.f32 %v724_v35, %v138_v44  ;;  %v154_v47 = vadd.f32 %v724_v35, %v153_v45  ;;  %v463_v49 = vpop.eup %462 }
  0xcb   :  { %v203_v50 = vmul.f32 1.442695, %v463_v49  ;;  %v465_v51 = vpop.eup %464 }
  0xcc   :  { %466 = vtanh.f32 %v139_v46  ;;  %282 = vperm.xlu2 %453, %v465_v51   ;;  %v126_v51 = vpop.f32.mrf.mxu0 }
  0xcd   :  { %468 = vtanh.f32 %v154_v47 }
  0xce   :  { %470 = vpow2.f32 %v203_v50 }
  0xcf   :  { %472 = vtanh.f32 %v130_v52 }
  0xd1   :  { %v156_v53 = vpop.f32.mrf.mxu3  ;;  %v141_v54 = vpop.f32.mrf.mxu2 }
  0xd2   :  { %v467_v55 = vpop.eup %466  ;;  %v157_v56 = vadd.f32 %v724_v35, %v156_v53  ;;  %v142_v57 = vadd.f32 %v724_v35, %v141_v54  ;;  %v127_v54 = vadd.f32 %v724_v35, %v126_v51 }
  0xd3   :  { %v195_v58 = vmul.f32 1.442695, %v467_v55  ;;  %v469_v59 = vpop.eup %468 }
  0xd4   :  { %474 = vtanh.f32 %v157_v56  ;;  %v471_v61 = vpop.eup %470  ;;  %v205_v62 = vmul.f32 1.442695, %v469_v59 }
  0xd5   :  { %476 = vpow2.f32 %v195_v58  ;;  %287 = vperm.xlu2 %453, %v471_v61   ;;  %v473_v0 = vpop.eup %472  ;;  %v118_v61 = vadd.f32 %v724_v35, %v732_v48 }
  0xd6   :  { %478 = vtanh.f32 %v142_v57  ;;  %v189_v7 = vmul.f32 1.442695, %v473_v0 }
  0xd7   :  { %480 = vpow2.f32 %v205_v62 }
  0xd8   :  { %482 = vtanh.f32 %v121_v63 }
  0xd9   :  { %v159_v1 = vpop.f32.mrf.mxu3 }
  0xda   :  { %v475_v2 = vpop.eup %474  ;;  %v160_v3 = vadd.f32 %v724_v35, %v159_v1 }
  0xdb   :  { %v477_v4 = vpop.eup %476  ;;  %v207_v5 = vmul.f32 1.442695, %v475_v2 }
  0xdc   :  { %v479_v6 = vpop.eup %478  ;;  %484 = vtanh.f32 %v160_v3 }
  0xdd   :  { %v481_v8 = vpop.eup %480  ;;  %486 = vpow2.f32 %v207_v5  ;;  %v197_v11 = vmul.f32 1.442695, %v479_v6  ;;  %267 = vperm.xlu2 %453, %v477_v4  }
  0xde   :  { %292 = vperm.xlu1 %454, %v481_v8   ;;  %v483_v10 = vpop.eup %482  ;;  %488 = vpow2.f32 %v189_v7 }
  0xdf   :  { %490 = vtanh.f32 %v133_v9  ;;  %v183_v15 = vmul.f32 1.442695, %v483_v10 }
  0xe0   :  { %492 = vpow2.f32 %v197_v11 }
  0xe1   :  { %v162_v12 = vpop.f32.mrf.mxu3 }
  0xe2   :  { %v485_v14 = vpop.eup %484  ;;  %v163_v32 = vadd.f32 %v724_v35, %v162_v12  ;;  %v214_v35 = vlaneseq }
  0xe3   :  { %v487_v33 = vpop.eup %486  ;;  %v209_v38 = vmul.f32 1.442695, %v485_v14 }
  0xe4   :  { %494 = vtanh.f32 %v163_v32  ;;  %v489_v40 = vpop.eup %488  ;;  %v749_v8 = vand.u32 127, %v214_v35 }
  0xe5   :  { %496 = vpow2.f32 %v209_v38  ;;  %252 = vperm.xlu2 %453, %v489_v40   ;;  %v491_v41 = vpop.eup %490 }
  0xe6   :  { %498 = vpow2.f32 %v183_v15  ;;  %297 = vperm.xlu1 %454, %v487_v33   ;;  %v493_v42 = vpop.eup %492  ;;  %v191_v45 = vmul.f32 1.442695, %v491_v41  ;;  %vm229_vm0 = vcmp.eq.s32.totalorder %v749_v8, 32 }
  0xe7   :  { %500 = vtanh.f32 %v145_v37 }
  0xe8   :  { %502 = vtanh.f32 %v124_v36 }
  0xea   :  { %v495_v43 = vpop.eup %494 }
  0xeb   :  { %v497_v44 = vpop.eup %496  ;;  %v211_v46 = vmul.f32 1.442695, %v495_v43 }
  0xec   :  { %v499_v47 = vpop.eup %498  ;;  %302 = vperm.xlu0 %455, %v497_v44  }
  0xed   :  { %v501_v49 = vpop.eup %500  ;;  %504 = vpow2.f32 %v211_v46  ;;  %237 = vperm.xlu2 %453, %v499_v47  }
  0xee   :  { %v503_v50 = vpop.eup %502  ;;  %272 = vperm.xlu1 %454, %v493_v42   ;;  %506 = vpow2.f32 %v191_v45  ;;  %v199_v52 = vmul.f32 1.442695, %v501_v49 }
  0xef   :  { %508 = vtanh.f32 %v136_v34  ;;  %v185_v53 = vmul.f32 1.442695, %v503_v50 }
  0xf0   :  { %510 = vpow2.f32 %v199_v52 }
  0xf1   :  { %512 = vpow2.f32 %v185_v53 }
  0xf2   :  { %514 = vtanh.f32 %v127_v54 }
  0xf3   :  { %v505_v55 = vpop.eup %504 }
  0xf4   :  { %307 = vperm.xlu0 %455, %v505_v55   ;;  %v507_v56 = vpop.eup %506  ;;  %v215_v55 = vshrl.u32 %v214_v35, 7 }
  0xf5   :  { %v509_v57 = vpop.eup %508 }
  0xf6   :  { %257 = vperm.xlu1 %454, %v507_v56   ;;  %v193_v39 = vmul.f32 1.442695, %v509_v57  ;;  %v511_v58 = vpop.eup %510  ;;  %v459_v56 = vld [vmem:[#allocation3] ss:$0 sm:$0xff] }
  0xf7   :  { %v513_v59 = vpop.eup %512  ;;  %vm219_vm1 = vcmp.eq.s32.totalorder %v215_v55, %v459_v56 }
  0xf8   :  { %v515_v60 = vpop.eup %514  ;;  %516 = vpow2.f32 %v193_v39  ;;  %v634_v39 = vmov 1.0  }
  0xf9   :  { %v187_v62 = vmul.f32 1.442695, %v515_v60  ;;  %518 = vtanh.f32 %v118_v61 }
  0xfb   :  { %520 = vpow2.f32 %v187_v62 }
  0xfc   :  { %277 = vperm.xlu0 %455, %v511_v58   ;;  %v635_v58 = vmov 32  }
  0xfe   :  { %242 = vperm.xlu1 %454, %v513_v59   ;;  %v517_v63 = vpop.eup %516 }
  0xff   :  { %v519_v0 = vpop.eup %518 }
 0x100   :  { %v181_v2 = vmul.f32 1.442695, %v519_v0 }
 0x101   :  { %v521_v1 = vpop.eup %520 }
 0x102   :  { %522 = vpow2.f32 %v181_v2 }
 0x104   :  { %262 = vperm.xlu0 %455, %v517_v63  }
 0x106   :  { %456 = vset.pattern.permute.xlu1 %v635_v58 }
 0x108   :  { %v523_v3 = vpop.eup %522 }
 0x10c   :  { %247 = vperm.xlu0 %455, %v521_v1  }
 0x114   :  { %232 = vperm.xlu0 %455, %v523_v3  }
 0x11c   :  { %457 = vset.pattern.permute.xlu0 %v635_v58 }
 0x126   :  { %v283_v5 = vpop.permute.xlu2 %282 }
 0x12f   :  { %v288_v48 = vpop.permute.xlu2 %287 }
 0x137   :  { %v268_v33 = vpop.permute.xlu2 %267 }
 0x138   :  { %v317_v42 = vmul.f32 %v268_v33, %v695_v24 }
 0x13a   :  { %v333_v46 = vsel %vm229_vm0, %v268_v33, %v317_v42 }
 0x13f   :  { %v253_v43 = vpop.permute.xlu2 %252 }
 0x140   :  { %v314_v24 = vmul.f32 %v253_v43, %v671_v16 }
 0x142   :  { %v330_v52 = vsel %vm229_vm0, %v253_v43, %v314_v24 }
 0x147   :  { %v238_v49 = vpop.permute.xlu2 %237 }
 0x148   :  { %v311_v16 = vmul.f32 %v238_v49, %v692_v23 }
 0x150   :  { %v293_v4 = vpop.permute.xlu1 %292 }
 0x151   :  { %v322_v15 = vmul.f32 %v293_v4, %v697_v25 }
 0x153   :  { %v338_v38 = vsel %vm229_vm0, %v293_v4, %v322_v15 }
 0x158   :  { %v298_v6 = vpop.permute.xlu1 %297 }
 0x159   :  { %v323_v13 = vmul.f32 %v298_v6, %v704_v27  ;;  %v320_v27 = vmul.f32 %v283_v5, %v679_v19 }
 0x15b   :  { %v336_v41 = vsel %vm229_vm0, %v283_v5, %v320_v27 }
 0x15e   :  { %v303_v7 = vpop.permute.xlu0 %302 }
 0x15f   :  { %v324_v10 = vmul.f32 %v303_v7, %v713_v30  ;;  %v321_v30 = vmul.f32 %v288_v48, %v688_v22 }
 0x160   :  { %v273_v12 = vpop.permute.xlu1 %272 }
 0x161   :  { %v340_v32 = vsel %vm229_vm0, %v303_v7, %v324_v10  ;;  %v337_v36 = vsel %vm229_vm0, %v288_v48, %v321_v30  ;;  %v318_v22 = vmul.f32 %v273_v12, %v706_v28 }
 0x163   :  { %v334_v45 = vsel %vm229_vm0, %v273_v12, %v318_v22 }
 0x166   :  { %v308_v9 = vpop.permute.xlu0 %307 }
 0x167   :  { %v325_v11 = vmul.f32 %v308_v9, %v716_v31  ;;  %v339_v31 = vsel %vm229_vm0, %v298_v6, %v323_v13 }
 0x168   :  { %v258_v40 = vpop.permute.xlu1 %257 }
 0x169   :  { %v341_v14 = vsel %vm229_vm0, %v308_v9, %v325_v11  ;;  %v315_v28 = vmul.f32 %v258_v40, %v677_v18 }
 0x16a   :  { %343 = vmatpush.msra.mxu1 %v341_v14 }
 0x16c   :  { %344 = vmatpush.msra.mxu1 %v340_v32 }
 0x16e   :  { %345 = vmatpush.msra.mxu1 %v339_v31  ;;  %v278_v37 = vpop.permute.xlu0 %277 }
 0x16f   :  { %v319_v25 = vmul.f32 %v278_v37, %v673_v17 }
 0x170   :  { %346 = vmatpush.msra.mxu1 %v338_v38  ;;  %v243_v34 = vpop.permute.xlu1 %242 }
 0x171   :  { %v335_v19 = vsel %vm229_vm0, %v278_v37, %v319_v25  ;;  %v312_v51 = vmul.f32 %v243_v34, %v699_v26  ;;  %v327_v26 = vsel %vm229_vm0, %v238_v49, %v311_v16 }
 0x172   :  { %347 = vmatpush.msra.mxu1 %v337_v36 }
 0x173   :  { %v328_v54 = vsel %vm229_vm0, %v243_v34, %v312_v51 }
 0x174   :  { %348 = vmatpush.msra.mxu1 %v336_v41 }
 0x176   :  { %349 = vmatpush.msra.mxu1 %v335_v19  ;;  %v263_v44 = vpop.permute.xlu0 %262 }
 0x177   :  { %v316_v17 = vmul.f32 %v263_v44, %v686_v21  ;;  %v331_v21 = vsel %vm229_vm0, %v258_v40, %v315_v28 }
 0x178   :  { %350 = vmatpush.msra.mxu1 %v334_v45 }
 0x179   :  { %v332_v47 = vsel %vm229_vm0, %v263_v44, %v316_v17 }
 0x17a   :  { %351 = vmatpush.msra.mxu1 %v333_v46 }
 0x17c   :  { %352 = vmatpush.msra.mxu1 %v332_v47 }
 0x17e   :  { %353 = vmatpush.msra.mxu1 %v331_v21  ;;  %v248_v50 = vpop.permute.xlu0 %247 }
 0x17f   :  { %v313_v18 = vmul.f32 %v248_v50, %v708_v29 }
 0x180   :  { %354 = vmatpush.msra.mxu1 %v330_v52 }
 0x181   :  { %v329_v53 = vsel %vm229_vm0, %v248_v50, %v313_v18 }
 0x182   :  { %355 = vmatpush.msra.mxu1 %v329_v53 }
 0x184   :  { %356 = vmatpush.msra.mxu1 %v328_v54 }
 0x186   :  { %357 = vmatpush.msra.mxu1 %v327_v26  ;;  %v233_v29 = vpop.permute.xlu0 %232 }
 0x187   :  { %v310_v57 = vmul.f32 %v233_v29, %v683_v20 }
 0x189   :  { %v326_v23 = vsel %vm229_vm0, %v233_v29, %v310_v57 }
 0x18a   :  { %358 = vmatpush.msra.mxu1 %v326_v23 }
 0x18b   :  { %411 = vmatmul.msk.f32.vlgmr.msra.gmra.mxu1 %vm219_vm1, %v634_v39 }
 0x208   :  { %v360_v59 = vpop.f32.mrf.mxu1 }
 0x209   :  { %vm369_vm2 = vcmp.gt.f32.partialorder %v360_v59, 0.0 }
 0x20a   :  { %v370_v60 = vsel %vm369_vm2, %v360_v59, 1.0 }
 0x20b   :  { %524 = vrcp.f32 %v370_v60  ;;  %v382_v0 = vand.u32 2147483648, %v370_v60  ;;  %v380_v20 = vand.u32 2147483647, %v370_v60  ;;  %vm376_vm4 = vweird.f32 %v370_v60 }
 0x20d   :  { %v383_v3 = vor.u32 1.1754944e-38, %v382_v0  ;;  %vm381_vm6 = vcmp.eq.f32.partialorder %v380_v20, 8.507059e+37 }
 0x211   :  { %v525_v61 = vpop.eup %524 }
 0x212   :  { %v372_v62 = vmul.f32 %v525_v61, %v370_v60  ;;  %vm377_vm3 = vweird.f32 %v525_v61 }
 0x213   :  { %vm378_vm5 = vmor %vm376_vm4, %vm377_vm3 }
 0x214   :  { %v373_v63 = vsub.f32 1.0, %v372_v62 }
 0x216   :  { %v374_v1 = vmul.f32 %v525_v61, %v373_v63 }
 0x218   :  { %v375_v2 = vadd.f32 %v525_v61, %v374_v1 }
 0x21a   :  { %v379_v4 = vsel %vm378_vm5, %v525_v61, %v375_v2 }
 0x21b   :  { %v384_v5 = vsel %vm381_vm6, %v383_v3, %v379_v4 }
 0x21c   :  { %387 = vperm.xlu1 %456, %v384_v5  }
 0x28e   :  { %v388_v6 = vpop.permute.xlu1 %387 }
 0x28f   :  { %v390_v7 = vmul.f32 %v388_v6, %v360_v59 }
 0x291   :  { %391 = vst [vmem:[#allocation9] sm:$0xff] %v390_v7 }
 0x292   :  { %402 = dma.vmem_to_hbm [thread:$0]  %s398_s5, 128, %s400_s8, [#allocation5]  }
 0x293   :  { %626 = dma.done.wait [#allocation5], 128  }
 0x294   :  { %627 = vsyncadd [#allocation5], 4294967168 }
 0x295   :  { %407 = vsyncpa [#allocation4], 1 }
 0x296   :  { %408 = vsyncpa [#allocation7], 1 }
 0x297   :  { %409 = vsyncpa [#allocation5], 1 }

</bundles_post_ra>
